<compile_context>
chip_gen: v7x
topology: tpu7x:2x2x1
jax: 0.10.0
libtpu: 0.0.40
codegen_flags: <defaults>
</compile_context>

<pallas_src>
import functools

import jax
import jax.numpy as jnp
from jax.experimental import pallas as pl
from jax.experimental.pallas import tpu as pltpu

BETA_0 = 0.1
BETA_1 = 20.0


def _elu(z):
    # torch.nn.ELU(alpha=1.0); clamp the exp argument so the unselected branch
    # never produces inf (and costs no extra EUP range).
    return jnp.where(z > 0, z, jnp.exp(jnp.minimum(z, 0.0)) - 1.0)


def _layer_shapes(hidden_dims, converted_table_dim):
    shapes = []
    din = converted_table_dim
    for item in hidden_dims:
        shapes.append((din, din + item))
        din = din + item
    return shapes, din  # (per-ConcatSquash (din, dout)), input dim of final Linear


def make_tabnetwork_kernel(hidden_dims, converted_table_dim, beta_0, beta_1):
    """Kernel over refs: (t, xT, packed_layer_0..L-1, packed_final, out).

    Shapes inside the kernel (transposed, batch on lanes):
      t            : (1, TILE_B)
      xT           : (D_in, TILE_B)
      packed layer : (d_out, d_in + 2)   columns [W | b | wb+wg]  (PyTorch layout)
      packed final : (D_out, d_last + 1) columns [Wf | bf]
      out          : (D_out, TILE_B)
    """
    shapes, d_last = _layer_shapes(hidden_dims, converted_table_dim)
    n_hidden = len(shapes)

    def kernel(*refs):
        t_ref, x_ref = refs[0], refs[1]
        out_ref = refs[-1]

        t = t_ref[...]                                   # (1, TB) f32
        h = x_ref[...]                                   # (D_in, TB) f32

        for layer in range(n_hidden):
            d_in, _ = shapes[layer]
            Wp = refs[2 + layer][...]                    # (d_out, d_in + 2) f32
            W = Wp[:, :d_in]                             # (d_out, d_in)
            b = Wp[:, d_in:d_in + 1]                     # (d_out, 1)
            wbg = Wp[:, d_in + 1:d_in + 2]               # (d_out, 1)  == wb + wg

            # f32 MXU matmul (MXU nearly idle at these K; no bf16 casts needed).
            lin = jnp.dot(W, h, preferred_element_type=jnp.float32) + b
            # ConcatSquash gate: sigmoid(t*(wb+wg)) via a single tanh EUP push.
            gate = 0.5 * jnp.tanh((0.5 * wbg) * t) + 0.5
            h = _elu(lin * gate)

        Wfp = refs[2 + n_hidden][...]                    # (D_out, d_last + 1)
        Wf = Wfp[:, :d_last]
        bf = Wfp[:, d_last:d_last + 1]
        hfin = jnp.dot(Wf, h, preferred_element_type=jnp.float32) + bf

        # marginal_prob_std(t) = sqrt(1 - exp(2*log_mean_coeff)); divide via rsqrt*mul.
        # NOTE: like the PyTorch module, std -> 0 as t -> 0 (caller keeps t > 0).
        lmc = (-0.25 * (beta_1 - beta_0)) * (t * t) - (0.5 * beta_0) * t
        inv_std = jax.lax.rsqrt(1.0 - jnp.exp(2.0 * lmc))    # (1, TB)

        out_ref[...] = (hfin * inv_std).astype(out_ref.dtype)

    return kernel


def init_params(key, hidden_dims, converted_table_dim):
    """Parameters in PyTorch layout: per ConcatSquash block
    [W (out,in), b (out,1), wb (out,1), wg (out,1)], then Wf (Dout,in), bf (Dout,1)."""
    params = []
    dim = converted_table_dim
    for item in hidden_dims:
        out_dim = dim + item
        key, k1, k2, k3, k4 = jax.random.split(key, 5)
        params += [
            jax.random.normal(k1, (out_dim, dim), jnp.float32) * 0.1,
            jax.random.normal(k2, (out_dim, 1), jnp.float32) * 0.1,
            jax.random.normal(k3, (out_dim, 1), jnp.float32) * 0.1,
            jax.random.normal(k4, (out_dim, 1), jnp.float32) * 0.1,
        ]
        dim = out_dim
    key, k1, k2 = jax.random.split(key, 3)
    params += [
        jax.random.normal(k1, (converted_table_dim, dim), jnp.float32) * 0.1,
        jax.random.normal(k2, (converted_table_dim, 1), jnp.float32) * 0.1,
    ]
    return params


def pack_params(params, hidden_dims, converted_table_dim):
    """Fold hyper_bias+hyper_gate and pack each layer into a single operand.

    Done ONCE (outside the jitted forward):
      hidden layer l -> (d_out, d_in + 2) = [W | b | wb+wg]
      final layer    -> (D_out, d_last + 1) = [Wf | bf]
    """
    del converted_table_dim  # shapes are implied by the arrays themselves
    packed = []
    idx = 0
    for _ in hidden_dims:
        W, b, wb, wg = params[idx], params[idx + 1], params[idx + 2], params[idx + 3]
        idx += 4
        packed.append(jnp.concatenate([W, b, wb + wg], axis=1).astype(jnp.float32))
    Wf, bf = params[idx], params[idx + 1]
    packed.append(jnp.concatenate([Wf, bf], axis=1).astype(jnp.float32))
    return tuple(packed)


@functools.partial(
    jax.jit, static_argnames=("hidden_dims", "converted_table_dim", "max_tile_b"))
def tabnetwork_forward(x, t, packed_params, hidden_dims, converted_table_dim,
                       max_tile_b=8192):
    B, D = x.shape

    # Grid sized to the TC count: tile_b = half of the 128-rounded batch -> grid=(2,)
    # whenever B >= 256 (both v7x TensorCores busy; only 2 fixed grid-step overheads
    # on v5e/v6e).  max_tile_b caps VMEM if the batch is ever scaled up (v7x: 64 MiB).
    tile_b = min(max_tile_b, max(128, pl.cdiv(B, 2 * 128) * 128))
    pb = pl.cdiv(B, tile_b) * tile_b
    pad = pb - B
    grid = (pb // tile_b,)

    # Batch on the lane axis; pad t with 1.0 so padded lanes stay finite (sliced off).
    xT = jnp.pad(x.T.astype(jnp.float32), ((0, 0), (0, pad)))
    t_row = jnp.pad(t.reshape(1, B).astype(jnp.float32), ((0, 0), (0, pad)),
                    constant_values=1.0)

    in_specs = [
        pl.BlockSpec((1, tile_b), lambda i: (0, i)),       # t
        pl.BlockSpec((D, tile_b), lambda i: (0, i)),       # xT
    ]
    # Packed parameters: full-array blocks, constant index_map -> VMEM-resident,
    # one prologue DMA per layer.
    in_specs += [pl.BlockSpec(p.shape, lambda i: (0, 0)) for p in packed_params]
    out_spec = pl.BlockSpec((converted_table_dim, tile_b), lambda i: (0, i))

    kernel = make_tabnetwork_kernel(hidden_dims, converted_table_dim, BETA_0, BETA_1)
    outT = pl.pallas_call(
        kernel,
        out_shape=jax.ShapeDtypeStruct((converted_table_dim, pb), jnp.float32),
        grid=grid,
        in_specs=in_specs,
        out_specs=out_spec,
        compiler_params=pltpu.CompilerParams(
            dimension_semantics=("parallel",),
        ),
    )(t_row, xT, *packed_params)

    return outT[:, :B].T                                   # (B, D_out)


def tabnetwork_reference(x, t, params, hidden_dims):
    """Pure-JAX f32 reference mirroring the PyTorch forward exactly."""
    h = x.astype(jnp.float32)
    t2 = t.reshape(-1, 1).astype(jnp.float32)
    idx = 0
    for _ in hidden_dims:
        W, b, wb, wg = params[idx], params[idx + 1], params[idx + 2], params[idx + 3]
        idx += 4
        lin = jnp.dot(h, W.T, precision="highest") + b[:, 0]
        gate = jax.nn.sigmoid(t2 * wb[:, 0] + t2 * wg[:, 0])
        h = _elu(lin * gate)
    Wf, bf = params[idx], params[idx + 1]
    hfin = jnp.dot(h, Wf.T, precision="highest") + bf[:, 0]
    log_mean_coeff = -0.25 * t2 * t2 * (BETA_1 - BETA_0) - 0.5 * t2 * BETA_0
    std = jnp.sqrt(1.0 - jnp.exp(2.0 * log_mean_coeff))
    return hfin / std


if __name__ == "__main__":
    hidden_dims = (32, 16)
    converted_table_dim = 16
    B = 256            # -> tile_b=128, grid=(2,): both v7x cores get a step

    key = jax.random.PRNGKey(0)
    kx, kt, kp = jax.random.split(key, 3)

    x = jax.random.normal(kx, (B, converted_table_dim), jnp.float32)
    # t in (0, 1] so marginal_prob_std is well defined (std > 0)
    t = jax.random.uniform(kt, (B,), jnp.float32, minval=0.1, maxval=1.0)

    params = init_params(kp, hidden_dims, converted_table_dim)
    packed = pack_params(params, hidden_dims, converted_table_dim)

    out = tabnetwork_forward(x, t, packed, hidden_dims=hidden_dims,
                             converted_table_dim=converted_table_dim)
    out = jax.block_until_ready(out)

    ref = tabnetwork_reference(x, t, params, hidden_dims)
    assert out.shape == ref.shape, (out.shape, ref.shape)
    max_err = float(jnp.max(jnp.abs(out - ref)))
    # f32 matmuls in the kernel vs highest-precision f32 reference -> tight tolerance.
    assert jnp.allclose(out, ref, atol=2e-3, rtol=1e-3), (
        f"Pallas output mismatch vs reference: max abs err {max_err}")

    print("KERNEL_OK")
</pallas_src>

<mosaic_0001>
module attributes {stable_mosaic.version = 11 : i64} {
  func.func @kernel(%arg0: i32, %arg1: memref<1x128xf32, #tpu.memory_space<vmem>>, %arg2: memref<16x128xf32, #tpu.memory_space<vmem>>, %arg3: memref<48x18xf32, #tpu.memory_space<vmem>>, %arg4: memref<64x50xf32, #tpu.memory_space<vmem>>, %arg5: memref<16x65xf32, #tpu.memory_space<vmem>>, %arg6: memref<16x128xf32, #tpu.memory_space<vmem>>) attributes {dimension_semantics = [#tpu.dimension_semantics<parallel>], iteration_bounds = array<i64: 2>, scalar_prefetch = 0 : i64, scratch_operands = 0 : i64, tpu.core_type = #tpu.core_type<tc>, window_params = [{transform_indices = @transform_0, window_bounds = array<i64: 1, 128>}, {transform_indices = @transform_1, window_bounds = array<i64: 16, 128>}, {pipeline_mode = #tpu.pipeline_mode<synchronous>, transform_indices = @transform_2, window_bounds = array<i64: 48, 18>}, {pipeline_mode = #tpu.pipeline_mode<synchronous>, transform_indices = @transform_3, window_bounds = array<i64: 64, 50>}, {pipeline_mode = #tpu.pipeline_mode<synchronous>, transform_indices = @transform_4, window_bounds = array<i64: 16, 65>}, {transform_indices = @transform_5, window_bounds = array<i64: 16, 128>}]} {
    %c0 = arith.constant 0 : index
    %c0_0 = arith.constant 0 : index
    %0 = vector.load %arg1[%c0, %c0_0] : memref<1x128xf32, #tpu.memory_space<vmem>>, vector<1x128xf32>
    %c0_1 = arith.constant 0 : index
    %c0_2 = arith.constant 0 : index
    %1 = vector.load %arg2[%c0_1, %c0_2] : memref<16x128xf32, #tpu.memory_space<vmem>>, vector<16x128xf32>
    %c0_3 = arith.constant 0 : index
    %c0_4 = arith.constant 0 : index
    %2 = vector.load %arg3[%c0_3, %c0_4] : memref<48x18xf32, #tpu.memory_space<vmem>>, vector<48x18xf32>
    %3 = vector.extract_strided_slice %2 {offsets = [0, 0], sizes = [48, 16], strides = [1, 1]} : vector<48x18xf32> to vector<48x16xf32>
    %4 = vector.extract_strided_slice %2 {offsets = [0, 16], sizes = [48, 1], strides = [1, 1]} : vector<48x18xf32> to vector<48x1xf32>
    %5 = vector.extract_strided_slice %2 {offsets = [0, 17], sizes = [48, 1], strides = [1, 1]} : vector<48x18xf32> to vector<48x1xf32>
    %cst = arith.constant dense<0.000000e+00> : vector<48x128xf32>
    %6 = tpu.matmul %3, %1, %cst {dimension_numbers = #tpu.dot_dimension_numbers<[1], [0], [0], [1], [0, 0, 1, 1], [], []>} : vector<48x16xf32>, vector<16x128xf32>, vector<48x128xf32> -> vector<48x128xf32>
    %7 = vector.broadcast %4 : vector<48x1xf32> to vector<48x128xf32>
    %8 = arith.addf %6, %7 : vector<48x128xf32>
    %cst_5 = arith.constant 5.000000e-01 : f32
    %9 = vector.broadcast %cst_5 : f32 to vector<48x1xf32>
    %10 = arith.mulf %9, %5 : vector<48x1xf32>
    %11 = vector.broadcast %10 : vector<48x1xf32> to vector<48x128xf32>
    %12 = vector.broadcast %0 : vector<1x128xf32> to vector<48x128xf32>
    %13 = arith.mulf %11, %12 : vector<48x128xf32>
    %14 = math.tanh %13 : vector<48x128xf32>
    %cst_6 = arith.constant 5.000000e-01 : f32
    %15 = vector.broadcast %cst_6 : f32 to vector<48x128xf32>
    %16 = arith.mulf %15, %14 : vector<48x128xf32>
    %cst_7 = arith.constant 5.000000e-01 : f32
    %17 = vector.broadcast %cst_7 : f32 to vector<48x128xf32>
    %18 = arith.addf %16, %17 : vector<48x128xf32>
    %19 = arith.mulf %8, %18 : vector<48x128xf32>
    %cst_8 = arith.constant 0.000000e+00 : f32
    %20 = vector.broadcast %cst_8 : f32 to vector<48x128xf32>
    %21 = arith.cmpf ogt, %19, %20 : vector<48x128xf32>
    %cst_9 = arith.constant 0.000000e+00 : f32
    %22 = vector.broadcast %cst_9 : f32 to vector<48x128xf32>
    %23 = arith.minimumf %19, %22 : vector<48x128xf32>
    %24 = math.exp %23 : vector<48x128xf32>
    %cst_10 = arith.constant 1.000000e+00 : f32
    %25 = vector.broadcast %cst_10 : f32 to vector<48x128xf32>
    %26 = arith.subf %24, %25 : vector<48x128xf32>
    %27 = arith.select %21, %19, %26 : vector<48x128xi1>, vector<48x128xf32>
    %c0_11 = arith.constant 0 : index
    %c0_12 = arith.constant 0 : index
    %28 = vector.load %arg4[%c0_11, %c0_12] : memref<64x50xf32, #tpu.memory_space<vmem>>, vector<64x50xf32>
    %29 = vector.extract_strided_slice %28 {offsets = [0, 0], sizes = [64, 48], strides = [1, 1]} : vector<64x50xf32> to vector<64x48xf32>
    %30 = vector.extract_strided_slice %28 {offsets = [0, 48], sizes = [64, 1], strides = [1, 1]} : vector<64x50xf32> to vector<64x1xf32>
    %31 = vector.extract_strided_slice %28 {offsets = [0, 49], sizes = [64, 1], strides = [1, 1]} : vector<64x50xf32> to vector<64x1xf32>
    %cst_13 = arith.constant dense<0.000000e+00> : vector<64x128xf32>
    %32 = tpu.matmul %29, %27, %cst_13 {dimension_numbers = #tpu.dot_dimension_numbers<[1], [0], [0], [1], [0, 0, 1, 1], [], []>} : vector<64x48xf32>, vector<48x128xf32>, vector<64x128xf32> -> vector<64x128xf32>
    %33 = vector.broadcast %30 : vector<64x1xf32> to vector<64x128xf32>
    %34 = arith.addf %32, %33 : vector<64x128xf32>
    %cst_14 = arith.constant 5.000000e-01 : f32
    %35 = vector.broadcast %cst_14 : f32 to vector<64x1xf32>
    %36 = arith.mulf %35, %31 : vector<64x1xf32>
    %37 = vector.broadcast %36 : vector<64x1xf32> to vector<64x128xf32>
    %38 = vector.broadcast %0 : vector<1x128xf32> to vector<64x128xf32>
    %39 = arith.mulf %37, %38 : vector<64x128xf32>
    %40 = math.tanh %39 : vector<64x128xf32>
    %cst_15 = arith.constant 5.000000e-01 : f32
    %41 = vector.broadcast %cst_15 : f32 to vector<64x128xf32>
    %42 = arith.mulf %41, %40 : vector<64x128xf32>
    %cst_16 = arith.constant 5.000000e-01 : f32
    %43 = vector.broadcast %cst_16 : f32 to vector<64x128xf32>
    %44 = arith.addf %42, %43 : vector<64x128xf32>
    %45 = arith.mulf %34, %44 : vector<64x128xf32>
    %cst_17 = arith.constant 0.000000e+00 : f32
    %46 = vector.broadcast %cst_17 : f32 to vector<64x128xf32>
    %47 = arith.cmpf ogt, %45, %46 : vector<64x128xf32>
    %cst_18 = arith.constant 0.000000e+00 : f32
    %48 = vector.broadcast %cst_18 : f32 to vector<64x128xf32>
    %49 = arith.minimumf %45, %48 : vector<64x128xf32>
    %50 = math.exp %49 : vector<64x128xf32>
    %cst_19 = arith.constant 1.000000e+00 : f32
    %51 = vector.broadcast %cst_19 : f32 to vector<64x128xf32>
    %52 = arith.subf %50, %51 : vector<64x128xf32>
    %53 = arith.select %47, %45, %52 : vector<64x128xi1>, vector<64x128xf32>
    %c0_20 = arith.constant 0 : index
    %c0_21 = arith.constant 0 : index
    %54 = vector.load %arg5[%c0_20, %c0_21] : memref<16x65xf32, #tpu.memory_space<vmem>>, vector<16x65xf32>
    %55 = vector.extract_strided_slice %54 {offsets = [0, 0], sizes = [16, 64], strides = [1, 1]} : vector<16x65xf32> to vector<16x64xf32>
    %56 = vector.extract_strided_slice %54 {offsets = [0, 64], sizes = [16, 1], strides = [1, 1]} : vector<16x65xf32> to vector<16x1xf32>
    %cst_22 = arith.constant dense<0.000000e+00> : vector<16x128xf32>
    %57 = tpu.matmul %55, %53, %cst_22 {dimension_numbers = #tpu.dot_dimension_numbers<[1], [0], [0], [1], [0, 0, 1, 1], [], []>} : vector<16x64xf32>, vector<64x128xf32>, vector<16x128xf32> -> vector<16x128xf32>
    %58 = vector.broadcast %56 : vector<16x1xf32> to vector<16x128xf32>
    %59 = arith.addf %57, %58 : vector<16x128xf32>
    %60 = arith.mulf %0, %0 : vector<1x128xf32>
    %cst_23 = arith.constant -4.975000e+00 : f32
    %61 = vector.broadcast %cst_23 : f32 to vector<1x128xf32>
    %62 = arith.mulf %61, %60 : vector<1x128xf32>
    %cst_24 = arith.constant 5.000000e-02 : f32
    %63 = vector.broadcast %cst_24 : f32 to vector<1x128xf32>
    %64 = arith.mulf %63, %0 : vector<1x128xf32>
    %65 = arith.subf %62, %64 : vector<1x128xf32>
    %cst_25 = arith.constant 2.000000e+00 : f32
    %66 = vector.broadcast %cst_25 : f32 to vector<1x128xf32>
    %67 = arith.mulf %66, %65 : vector<1x128xf32>
    %68 = math.exp %67 : vector<1x128xf32>
    %cst_26 = arith.constant 1.000000e+00 : f32
    %69 = vector.broadcast %cst_26 : f32 to vector<1x128xf32>
    %70 = arith.subf %69, %68 : vector<1x128xf32>
    %71 = math.rsqrt %70 : vector<1x128xf32>
    %72 = vector.broadcast %71 : vector<1x128xf32> to vector<16x128xf32>
    %73 = arith.mulf %59, %72 : vector<16x128xf32>
    %c0_27 = arith.constant 0 : index
    %c0_28 = arith.constant 0 : index
    %74 = vector.load %arg6[%c0_27, %c0_28] : memref<16x128xf32, #tpu.memory_space<vmem>>, vector<16x128xf32>
    tpu.vector_store %arg6[%c0_27, %c0_28], %73 {strides = array<i32>} : memref<16x128xf32, #tpu.memory_space<vmem>>, vector<16x128xf32>,
    return
  }
  func.func @transform_0(%arg0: i32) -> (i32, i32) {
    %c0_i32 = arith.constant 0 : i32
    %c0_i32_0 = arith.constant 0 : i32
    return %c0_i32, %arg0 : i32, i32
  }
  func.func @transform_1(%arg0: i32) -> (i32, i32) {
    %c0_i32 = arith.constant 0 : i32
    %c0_i32_0 = arith.constant 0 : i32
    return %c0_i32, %arg0 : i32, i32
  }
  func.func @transform_2(%arg0: i32) -> (i32, i32) {
    %c0_i32 = arith.constant 0 : i32
    %c0_i32_0 = arith.constant 0 : i32
    %c0_i32_1 = arith.constant 0 : i32
    return %c0_i32, %c0_i32_0 : i32, i32
  }
  func.func @transform_3(%arg0: i32) -> (i32, i32) {
    %c0_i32 = arith.constant 0 : i32
    %c0_i32_0 = arith.constant 0 : i32
    %c0_i32_1 = arith.constant 0 : i32
    return %c0_i32, %c0_i32_0 : i32, i32
  }
  func.func @transform_4(%arg0: i32) -> (i32, i32) {
    %c0_i32 = arith.constant 0 : i32
    %c0_i32_0 = arith.constant 0 : i32
    %c0_i32_1 = arith.constant 0 : i32
    return %c0_i32, %c0_i32_0 : i32, i32
  }
  func.func @transform_5(%arg0: i32) -> (i32, i32) {
    %c0_i32 = arith.constant 0 : i32
    %c0_i32_0 = arith.constant 0 : i32
    return %c0_i32, %arg0 : i32, i32
  }
}

</mosaic_0001>

<bundles_post_ra>
// kernel: tabnetwork_forward.1
= control target key start
LH: loop header
LB: loop body
LE: loop exit
PB: predicated region body
PF: predicated region fallthrough
CT: control target
= control target key end

     0   :  { %10 = vsyncpa [#allocation4], 0  ;;  %s1682_s0 = inlined_call_operand.vmem [shape: f32[1,256], index: 0, kind: input, shape index: {}]   ;;  %s1683_s1 = inlined_call_operand.vmem [shape: f32[16,256], index: 1, kind: input, shape index: {}]   ;;  %s1684_s2 = inlined_call_operand.vmem [shape: f32[48,18], index: 2, kind: input, shape index: {}]   ;;  %s1685_s3 = inlined_call_operand.vmem [shape: f32[64,50], index: 3, kind: input, shape index: {}]   ;;  %s1686_s4 = inlined_call_operand.vmem [shape: f32[16,65], index: 4, kind: input, shape index: {}]   ;;  %s1687_s5 = inlined_call_operand.hbm [shape: f32[16,256], index: 5, kind: output, shape index: {}]  }
   0x1   :  { %12 = vsyncpa [#allocation4 + $0x1], 0  ;;  %s1419_s18 = smov 0   ;;  %s1421_s19 = smov 0  }
   0x2   :  { %s1423_s20 = smov 0   ;;  %s1425_s21 = smov 0  }
   0x3 LB: > { %s1440_s22 = sadd.s32 4294967295, %s1378_s21   ;;  %s1037_s23 = sadd.s32 4294967294, %s1378_s21   ;;  %s1378_s21 = sphi %s1425_s21, %s1693_s21   ;;  %s1374_s20 = sphi %s1423_s20, %s1692_s20   ;;  %s1370_s19 = sphi %s1421_s19, %s1691_s19   ;;  %s1366_s18 = sphi %s1419_s18, %s1690_s18  }
   0x4   : > { %s1444_s24 = sadd.s32 1, %s1378_s21   ;;  %s51_s25 = sadd.s32 1, %s1374_s20 }
   0x5   : > { %s48_s26 = ssub.s32 %s1378_s21, %s1444_s24  ;;  %p58_p0 = scmp.ne.s32.totalorder %s1374_s20, %s1370_s19 }
   0x6   : > { %p49_p1 = scmp.eq.s32.totalorder %s48_s26, 0  ;;  %p59_p2 = scmp.eq.s32.totalorder %s1378_s21, 0 }
   0x7   : > { %p151_p3 = scmp.eq.s32.totalorder %s1440_s22, 1  ;;  %p156_p4 = scmp.ne.s32.totalorder %s1370_s19, %s1366_s18 }
   0x8   : > { %s1456_s27 = scalar_select %p49_p1, %s1374_s20, %s51_s25  }
   0x9   : > { %p60_p5 = por %p59_p2, %p58_p0  ;;  %p1458_p6 = por %p151_p3, %p58_p0 }
   0xa   : > { %p157_p7 = scmp.eq.s32.totalorder %s1037_s23, 1  ;;  %p1039_p9 = scmp.ge.s32.totalorder %s1378_s21, 2 }
   0xc   : > { %p1462_p8 = por %p157_p7, %p156_p4  ;;  %182 = sbr.rel (%p1039_p9) target bundleno = 26 (0x1a), region = 28 }
  0x13   : > { %191 = sbr.rel (!%p60_p5) target bundleno = 26 (0x1a), region = 36  ;;  %s193_s30 = sand.u32 (%p60_p5), 1, %s1374_s20  }
  0x14   : > { %s1041_s6 = sshll.u32 (%p60_p5), %s1378_s21, 3  ;;  %s1040_s7 = sshll.u32 (%p60_p5), %s193_s30, 4 }
  0x15   : > { %s197_s10 = scalar_lea.vmem (%p60_p5), %s1683_s1, %s1041_s6  ;;  %s195_s11 = scalar_lea.vmem (%p60_p5), [#allocation2], %s1040_s7 }
  0x16   : > { %v227_v0 = vld [vmem:[%s197_s10] sm:$0xff] (%p60_p5)  ;;  %v229_v1 = vld [vmem:[%s197_s10 + $0x10] sm:$0xff] (%p60_p5) }
  0x17   : > { %228 = vst [vmem:[%s195_s11] sm:$0xff] (%p60_p5), %v227_v0  ;;  %230 = vst [vmem:[%s195_s11 + $0x8] sm:$0xff] (%p60_p5), %v229_v1 }
  0x1a PF: > { %p1042_p10 = scmp.ge.s32.totalorder %s1378_s21, 1  ;;  %p235_p11 = scmp.lt.s32.totalorder %s1378_s21, 3 }
  0x1c   : > { %p236_p12 = pnand %p1042_p10, %p235_p11 }
  0x1d   : > { %s242_s12 = sand.u32 (!%p236_p12), 1, %s1370_s19   ;;  %v278_v2 = vld [vmem:[%s1684_s2] sm:$0xff] (!%p236_p12)  ;;  %vm314_vm0 = vcmask (!%p236_p12), 130048   ;;  %v280_v3 = vld [vmem:[%s1684_s2 + $0x10] sm:$0xff] (!%p236_p12)  ;;  %v1380_v4 = vmov (!%p236_p12), 17   ;;  %v279_v6 = vld [vmem:[%s1684_s2 + $0x8] sm:$0xff] (!%p236_p12)  ;;  %v459_v37 = vlaneseq (!%p236_p12) }
  0x1e   : > { %239 = sbr.rel (%p236_p12) target bundleno = 774 (0x306), region = 74  ;;  %s1482_s15 = sshll.u32 (!%p236_p12), %s242_s12, 4  ;;  %1115 = vmatprep.mubr.msk.f32.mxu0 (!%p236_p12), %vm314_vm0, %v278_v2  ;;  %1246 = vset.pattern.permute.xlu0 (!%p236_p12), %v1380_v4  ;;  %v422_v5 = vmul.f32 (!%p236_p12), 0.5, %v278_v2  ;;  %v424_v7 = vmul.f32 (!%p236_p12), 0.5, %v280_v3  ;;  %v281_v10 = vld [vmem:[%s1684_s2 + $0x18] sm:$0xff] (!%p236_p12)  ;;  %v423_v11 = vmul.f32 (!%p236_p12), 0.5, %v279_v6 }
  0x1f   : > { %1247 = vset.pattern.permute.xlu1 (!%p236_p12), %v1380_v4  ;;  %s244_s26 = scalar_lea.vmem (!%p236_p12), [#allocation2], %s1482_s15  ;;  %v425_v13 = vmul.f32 (!%p236_p12), 0.5, %v281_v10  ;;  %v282_v14 = vld [vmem:[%s1684_s2 + $0x20] sm:$0xff] (!%p236_p12)  ;;  %v283_v15 = vld [vmem:[%s1684_s2 + $0x28] sm:$0xff] (!%p236_p12)  ;;  %v1381_v18 = vmov (!%p236_p12), 16   ;;  %vm578_vm1 = vcmask (!%p236_p12), 392192  }
  0x20   : > { %v276_v8 = vld [vmem:[%s244_s26] sm:$0xff] (!%p236_p12)  ;;  %v277_v9 = vld [vmem:[%s244_s26 + $0x8] sm:$0xff] (!%p236_p12)  ;;  %430 = vperm.xlu0 (!%p236_p12), %1246, %v422_v5   ;;  %440 = vperm.xlu1 (!%p236_p12), %1247, %v424_v7   ;;  %v426_v16 = vmul.f32 (!%p236_p12), 0.5, %v282_v14  ;;  %v427_v17 = vmul.f32 (!%p236_p12), 0.5, %v283_v15  ;;  %v1382_v23 = vmov (!%p236_p12), 49   ;;  %v1383_v36 = vmov (!%p236_p12), 48  }
  0x21   : > { %v1167_v12 = vpack.c.bf16 (!%p236_p12), %v277_v9, %v276_v8  ;;  %v530_v19 = vld [vmem:[%s1685_s3] sm:$0xff] (!%p236_p12)  ;;  %v1513_v20 = vld [vmem:[%s1685_s3 + $0x8] sm:$0xff] (!%p236_p12)  ;;  %v1518_v22 = vld [vmem:[%s1685_s3 + $0x10] sm:$0xff] (!%p236_p12)  ;;  %p272_p13 = scmp.lt.s32.totalorder (!%p236_p12), %s1440_s22, 1  ;;  %v1561_v38 = vshrl.u32 (!%p236_p12), %v459_v37, 7  ;;  %vm848_vm8 = vcmask (!%p236_p12), 523264  }
  0x22   : > { %1136 = vmatprep.mubr.msk.f32.mxu1 (!%p236_p12), %vm578_vm1, %v530_v19  ;;  %v700_v21 = vmul.f32 (!%p236_p12), 0.5, %v530_v19  ;;  %v701_v24 = vmul.f32 (!%p236_p12), 0.5, %v1513_v20  ;;  %v1524_v25 = vld [vmem:[%s1685_s3 + $0x20] sm:$0xff] (!%p236_p12)  ;;  %v702_v26 = vmul.f32 (!%p236_p12), 0.5, %v1518_v22  ;;  %v1531_v28 = vld [vmem:[%s1685_s3 + $0x18] sm:$0xff] (!%p236_p12)  ;;  %v1536_v29 = vld [vmem:[%s1685_s3 + $0x30] sm:$0xff] (!%p236_p12) }
  0x23   : > { %1168 = vmatprep.subr.bf16.mxu0 (!%p236_p12), %v1167_v12  ;;  %v704_v27 = vmul.f32 (!%p236_p12), 0.5, %v1524_v25  ;;  %v703_v30 = vmul.f32 (!%p236_p12), 0.5, %v1531_v28  ;;  %v706_v31 = vmul.f32 (!%p236_p12), 0.5, %v1536_v29  ;;  %v1543_v32 = vld [vmem:[%s1685_s3 + $0x28] sm:$0xff] (!%p236_p12)  ;;  %v1549_v34 = vld [vmem:[%s1685_s3 + $0x38] sm:$0xff] (!%p236_p12)  ;;  %v461_v39 = vsub.s32 (!%p236_p12), 0, %v1561_v38 }
  0x24   : > { %1170 = vmatpush3.bf16.msra.mxu0 (!%p236_p12), %v1167_v12  ;;  %435 = vperm.xlu0 (!%p236_p12), %1246, %v423_v11   ;;  %v705_v33 = vmul.f32 (!%p236_p12), 0.5, %v1543_v32  ;;  %v707_v35 = vmul.f32 (!%p236_p12), 0.5, %v1549_v34  ;;  %s271_s7 = scalar_lea.vmem (!%p236_p12), [#allocation3], %s1482_s15  ;;  %s1076_s9 = sshll.u32 (!%p236_p12), %s1440_s22, 7 }
  0x25   : > { %445 = vperm.xlu1 %1247, %v425_v13   ;;  %s273_s14 = scalar_select %p272_p13, %s1440_s22, 1 }
  0x26   : > { %s960_s8 = sshll.u32 %s271_s7, 4  ;;  %s1636_s15 = scalar_lea.hbm %s1687_s5, %s1076_s9  ;;  %s1631_s8 = int_to_ptr.vmem [resolvable:$true] %s960_s8 }
  0x27   : > { %1116 = vmatmul.mubr.msk.f32.vlgmr.msra.gmra.mrb[0].mxu0 %vm314_vm0, %v279_v6  ;;  %s274_s23 = scalar_lea.vmem %s1682_s0, %s273_s14  ;;  %s1640_s13 = scalar_lea.sflag [#allocation4], %s242_s12 }
  0x28   : > { %1118 = vmatprep.mubr.msk.f32.mxu0 %vm314_vm0, %v280_v3  ;;  %450 = vperm.xlu0 %1246, %v426_v16   ;;  %v1567_v41 = vld [vmem:[%s274_s23] sm:$0x1]  ;;  %s1316_s22 = scalar_lea.vmem %s1631_s8, 256  ;;  %s1385_s14 = smov [#allocation3]  }
  0x29   : > { %455 = vperm.xlu1 %1247, %v427_v17   ;;  %v1572_v43 = vrot.slane %v1567_v41, %v461_v39  ;;  %p1317_p0 = scmp.ne.s32.totalorder %s1631_s8, %s1316_s22  ;;  %s1320_s16 = sshll.u32 %s1385_s14, 4  ;;  %s1321_s16 = int_to_ptr.vmem [resolvable:$false] %s1320_s16 }
  0x2a   : > { %s1322_s17 = scalar_lea.vmem %s1321_s16, 512  ;;  %p1323_p3 = scmp.lt.s32.totalorder %s1631_s8, %s1321_s16 }
  0x2b   : > { %1119 = vmatmul.mubr.msk.f32.gmra.mrb[2].mxu0 %vm314_vm0, %v281_v10  ;;  %p1318_p1 = pnand %p1317_p0, %p1458_p6  ;;  %p1324_p4 = scmp.lt.s32.totalorder %s1322_s17, %s1316_s22 }
  0x2c   : > { %1121 = vmatprep.mubr.msk.f32.mxu0 %vm314_vm0, %v282_v14  ;;  %1248 = vset.pattern.permute.xlu0 %v1381_v18 }
  0x2d   : > { %1249 = vset.pattern.permute.xlu1 %v1381_v18  ;;  %286 = vperm.xlu0 %1248, %v278_v2   ;;  %p1319_p2 = pneg %p1318_p1  ;;  %p1325_p5 = por %p1324_p4, %p1323_p3 }
  0x2e   : > { %291 = vperm.xlu1 %1249, %v279_v6  }
  0x2f   : > { %1122 = vmatmul.mubr.msk.f32.gmra.mrb[4].mxu0 %vm314_vm0, %v283_v15  ;;  %p1326_p7 = pnand %p1325_p5, %p1319_p2 }
  0x31   : > { %301 = vperm.xlu0 %1248, %v281_v10  }
  0x32   : > { %296 = vperm.xlu1 %1249, %v280_v3  }
  0x35   : > { %311 = vperm.xlu0 %1248, %v283_v15  }
  0x36   : > { %306 = vperm.xlu1 %1249, %v282_v14  }
  0x39   : > { %1251 = vset.pattern.permute.xlu0 %v1382_v23 }
  0x3a   : > { %1250 = vset.pattern.permute.xlu1 %v1382_v23  ;;  %715 = vperm.xlu0 %1251, %v701_v24  }
  0x3b   : > { %710 = vperm.xlu1 %1250, %v700_v21  }
  0x3e   : > { %730 = vperm.xlu0 %1251, %v704_v27  }
  0x3f   : > { %720 = vperm.xlu1 %1250, %v702_v26  }
  0x42   : > { %740 = vperm.xlu0 %1251, %v706_v31  }
  0x43   : > { %725 = vperm.xlu1 %1250, %v703_v30  }
  0x46   : > { %1252 = vset.pattern.permute.xlu0 %v1383_v36 }
  0x47   : > { %735 = vperm.xlu1 %1250, %v705_v33   ;;  %540 = vperm.xlu0 %1252, %v530_v19  }
  0x4b   : > { %745 = vperm.xlu1 %1250, %v707_v35   ;;  %555 = vperm.xlu0 %1252, %v1531_v28  }
  0x4f   : > { %1253 = vset.pattern.permute.xlu1 %v1383_v36  ;;  %565 = vperm.xlu0 %1252, %v1543_v32  }
  0x50   : > { %545 = vperm.xlu1 %1253, %v1513_v20  }
  0x53   : > { %575 = vperm.xlu0 %1252, %v1549_v34  }
  0x54   : > { %550 = vperm.xlu1 %1253, %v1518_v22  }
  0x58   : > { %560 = vperm.xlu1 %1253, %v1524_v25  }
  0x5c   : > { %570 = vperm.xlu1 %1253, %v1536_v29  }
  0x9f   : > { %v431_v40 = vpop.permute.xlu0 %430  ;;  %v441_v42 = vpop.permute.xlu1 %440 }
  0xa0   : > { %v464_v47 = vmul.f32 %v1572_v43, %v431_v40  ;;  %v466_v49 = vmul.f32 %v1572_v43, %v441_v42 }
  0xa3   : > { %v436_v44 = vpop.permute.xlu0 %435 }
  0xa4   : > { %v446_v45 = vpop.permute.xlu1 %445  ;;  %v465_v46 = vmul.f32 %v1572_v43, %v436_v44 }
  0xa5   : > { %v467_v48 = vmul.f32 %v1572_v43, %v446_v45 }
  0xa6   : > { %1256 = vtanh.f32 %v465_v46 }
  0xa7   : > { %1258 = vtanh.f32 %v464_v47  ;;  %v451_v51 = vpop.permute.xlu0 %450 }
  0xa8   : > { %v456_v50 = vpop.permute.xlu1 %455  ;;  %1260 = vtanh.f32 %v467_v48  ;;  %v468_v53 = vmul.f32 %v1572_v43, %v451_v51 }
  0xa9   : > { %v469_v52 = vmul.f32 %v1572_v43, %v456_v50  ;;  %1262 = vtanh.f32 %v466_v49 }
  0xab   : > { %1264 = vtanh.f32 %v469_v52 }
  0xac   : > { %1266 = vtanh.f32 %v468_v53  ;;  %v287_v56 = vpop.permute.xlu0 %286 }
  0xad   : > { %v292_v58 = vpop.permute.xlu1 %291 }
  0xb0   : > { %v1257_v54 = vpop.eup %1256  ;;  %v302_v6 = vpop.permute.xlu0 %301 }
  0xb1   : > { %v1259_v55 = vpop.eup %1258  ;;  %v477_v57 = vmul.f32 0.5, %v1257_v54  ;;  %v297_v9 = vpop.permute.xlu1 %296 }
  0xb2   : > { %v1261_v59 = vpop.eup %1260  ;;  %v476_v60 = vmul.f32 0.5, %v1259_v55 }
  0xb3   : > { %v1263_v61 = vpop.eup %1262  ;;  %v483_v63 = vadd.f32 0.5, %v477_v57  ;;  %v479_v0 = vmul.f32 0.5, %v1261_v59 }
  0xb4   : > { %v482_v4 = vadd.f32 0.5, %v476_v60  ;;  %v478_v5 = vmul.f32 0.5, %v1263_v61  ;;  %v312_v27 = vpop.permute.xlu0 %311 }
  0xb5   : > { %v1265_v3 = vpop.eup %1264  ;;  %v485_v13 = vadd.f32 0.5, %v479_v0  ;;  %v307_v36 = vpop.permute.xlu1 %306 }
  0xb6   : > { %v1267_v8 = vpop.eup %1266  ;;  %v481_v14 = vmul.f32 0.5, %v1265_v3  ;;  %v484_v18 = vadd.f32 0.5, %v478_v5 }
  0xb7   : > { %v480_v19 = vmul.f32 0.5, %v1267_v8 }
  0xb8   : > { %v487_v35 = vadd.f32 0.5, %v481_v14 }
  0xb9   : > { %v486_v44 = vadd.f32 0.5, %v480_v19 }
  0xfa   : > { %v1117_v62 = vpop.f32.mrb[0].mxu0 }
  0xfb   : > { %v399_v1 = vadd.f32 %v1117_v62, %v292_v58  ;;  %v393_v2 = vpop.f32.mrb[1].mxu0 }
  0xfc   : > { %v394_v7 = vadd.f32 %v393_v2, %v287_v56 }
  0xfd   : > { %v489_v10 = vmul.f32 %v483_v63, %v399_v1 }
  0xfe   : > { %v488_v11 = vmul.f32 %v482_v4, %v394_v7  ;;  %v1120_v12 = vpop.f32.mrb[2].mxu0 }
  0xff   : > { %v501_v15 = vmin.f32 %v489_v10, 0.0  ;;  %v409_v16 = vadd.f32 %v1120_v12, %v302_v6  ;;  %v403_v17 = vpop.f32.mrb[3].mxu0  ;;  %vm495_vm2 = vcmp.gt.f32.partialorder %v489_v10, 0.0 }
 0x100   : > { %v500_v21 = vmin.f32 %v488_v11, 0.0  ;;  %v404_v23 = vadd.f32 %v403_v17, %v297_v9  ;;  %vm494_vm3 = vcmp.gt.f32.partialorder %v488_v11, 0.0 }
 0x101   : > { %v508_v24 = vmul.f32 1.442695, %v501_v15  ;;  %v491_v26 = vmul.f32 %v485_v13, %v409_v16 }
 0x102   : > { %v506_v30 = vmul.f32 1.442695, %v500_v21  ;;  %v490_v31 = vmul.f32 %v484_v18, %v404_v23  ;;  %v1123_v33 = vpop.f32.mrb[4].mxu0 }
 0x103   : > { %1268 = vpow2.f32 %v508_v24  ;;  %v503_v37 = vmin.f32 %v491_v26, 0.0  ;;  %v419_v40 = vadd.f32 %v1123_v33, %v312_v27  ;;  %v413_v42 = vpop.f32.mrb[5].mxu0  ;;  %vm497_vm4 = vcmp.gt.f32.partialorder %v491_v26, 0.0 }
 0x104   : > { %1270 = vpow2.f32 %v506_v30  ;;  %v502_v45 = vmin.f32 %v490_v31, 0.0  ;;  %v414_v46 = vadd.f32 %v413_v42, %v307_v36  ;;  %vm496_vm5 = vcmp.gt.f32.partialorder %v490_v31, 0.0 }
 0x105   : > { %v512_v47 = vmul.f32 1.442695, %v503_v37  ;;  %v493_v48 = vmul.f32 %v487_v35, %v419_v40 }
 0x106   : > { %v510_v49 = vmul.f32 1.442695, %v502_v45  ;;  %v492_v50 = vmul.f32 %v486_v44, %v414_v46 }
 0x107   : > { %1272 = vpow2.f32 %v512_v47  ;;  %v505_v51 = vmin.f32 %v493_v48, 0.0  ;;  %vm499_vm6 = vcmp.gt.f32.partialorder %v493_v48, 0.0 }
 0x108   : > { %1274 = vpow2.f32 %v510_v49  ;;  %v504_v52 = vmin.f32 %v492_v50, 0.0  ;;  %vm498_vm7 = vcmp.gt.f32.partialorder %v492_v50, 0.0 }
 0x109   : > { %v516_v53 = vmul.f32 1.442695, %v505_v51 }
 0x10a   : > { %v514_v54 = vmul.f32 1.442695, %v504_v52 }
 0x10b   : > { %1276 = vpow2.f32 %v516_v53 }
 0x10c   : > { %1278 = vpow2.f32 %v514_v54 }
 0x10d   : > { %v1269_v55 = vpop.eup %1268 }
 0x10e   : > { %v1271_v56 = vpop.eup %1270  ;;  %v1052_v57 = vadd.f32 -1.0, %v1269_v55 }
 0x10f   : > { %v1051_v58 = vadd.f32 -1.0, %v1271_v56 }
 0x110   : > { %v525_v59 = vsel %vm495_vm2, %v489_v10, %v1052_v57 }
 0x111   : > { %v1273_v60 = vpop.eup %1272  ;;  %v524_v61 = vsel %vm494_vm3, %v488_v11, %v1051_v58 }
 0x112   : > { %v1275_v62 = vpop.eup %1274  ;;  %v1171_v63 = vpack.c.bf16 %v525_v59, %v524_v61  ;;  %v1054_v0 = vadd.f32 -1.0, %v1273_v60 }
 0x113   : > { %v1053_v1 = vadd.f32 -1.0, %v1275_v62 }
 0x114   : > { %1172 = vmatprep.subr.bf16.mxu1 %v1171_v63  ;;  %v527_v2 = vsel %vm497_vm4, %v491_v26, %v1054_v0 }
 0x115   : > { %v1277_v3 = vpop.eup %1276  ;;  %1174 = vmatpush3.bf16.msra.mxu1 %v1171_v63  ;;  %v526_v4 = vsel %vm496_vm5, %v490_v31, %v1053_v1 }
 0x116   : > { %v1279_v5 = vpop.eup %1278  ;;  %v1175_v6 = vpack.c.bf16 %v527_v2, %v526_v4  ;;  %v1056_v7 = vadd.f32 -1.0, %v1277_v3 }
 0x117   : > { %v1055_v8 = vadd.f32 -1.0, %v1279_v5 }
 0x118   : > { %1176 = vmatprep.subr.bf16.mxu1 %v1175_v6  ;;  %v529_v9 = vsel %vm499_vm6, %v493_v48, %v1056_v7 }
 0x119   : > { %1178 = vmatpush3.bf16.msra.mxu1 %v1175_v6  ;;  %v528_v10 = vsel %vm498_vm7, %v492_v50, %v1055_v8 }
 0x11a   : > { %v1179_v11 = vpack.c.bf16 %v529_v9, %v528_v10 }
 0x11c   : > { %1180 = vmatprep.subr.bf16.mxu1 %v1179_v11 }
 0x11d   : > { %1182 = vmatpush3.bf16.msra.mxu1 %v1179_v11 }
 0x120   : > { %1137 = vmatmul.mubr.msk.f32.vlgmr.msra.gmra.mrb[0].mxu1 %vm578_vm1, %v1513_v20  ;;  %v836_v20 = vld [vmem:[%s1686_s4] sm:$0xff] }
 0x121   : > { %1139 = vmatprep.mubr.msk.f32.mxu1 %vm578_vm1, %v1518_v22  ;;  %1164 = vmatprep.mubr.msk.f32.mxu0 %vm848_vm8, %v836_v20  ;;  %v1601_v22 = vld [vmem:[%s1686_s4 + $0x8] sm:$0xff] }
 0x124   : > { %1140 = vmatmul.mubr.msk.f32.gmra.mrb[2].mxu1 %vm578_vm1, %v1531_v28  ;;  %v711_v28 = vpop.permute.xlu1 %710 }
 0x125   : > { %1142 = vmatprep.mubr.msk.f32.mxu1 %vm578_vm1, %v1524_v25  ;;  %v1384_v25 = vmov 64   ;;  %v748_v13 = vmul.f32 %v711_v28, %v1572_v43 }
 0x126   : > { %1255 = vset.pattern.permute.xlu0 %v1384_v25  ;;  %1254 = vset.pattern.permute.xlu1 %v1384_v25 }
 0x127   : > { %845 = vperm.xlu0 %1255, %v1601_v22   ;;  %840 = vperm.xlu1 %1254, %v836_v20  }
 0x128   : > { %1143 = vmatmul.mubr.msk.f32.gmra.mrb[4].mxu1 %vm578_vm1, %v1543_v32  ;;  %v716_v32 = vpop.permute.xlu0 %715 }
 0x129   : > { %1145 = vmatprep.mubr.msk.f32.mxu1 %vm578_vm1, %v1536_v29  ;;  %v721_v29 = vpop.permute.xlu1 %720  ;;  %v749_v12 = vmul.f32 %v716_v32, %v1572_v43 }
 0x12a   : > { %v750_v17 = vmul.f32 %v721_v29, %v1572_v43 }
 0x12b   : > { %1280 = vtanh.f32 %v749_v12 }
 0x12c   : > { %1146 = vmatmul.mubr.msk.f32.gmra.mrb[6].mxu1 %vm578_vm1, %v1549_v34  ;;  %v731_v14 = vpop.permute.xlu0 %730  ;;  %1282 = vtanh.f32 %v748_v13 }
 0x12d   : > { %v726_v34 = vpop.permute.xlu1 %725  ;;  %v752_v18 = vmul.f32 %v731_v14, %v1572_v43 }
 0x12e   : > { %v751_v16 = vmul.f32 %v726_v34, %v1572_v43 }
 0x130   : > { %1284 = vtanh.f32 %v751_v16  ;;  %v741_v21 = vpop.permute.xlu0 %740 }
 0x131   : > { %v736_v15 = vpop.permute.xlu1 %735  ;;  %1286 = vtanh.f32 %v750_v17  ;;  %v754_v27 = vmul.f32 %v741_v21, %v1572_v43 }
 0x132   : > { %v753_v19 = vmul.f32 %v736_v15, %v1572_v43  ;;  %1288 = vtanh.f32 %v752_v18 }
 0x134   : > { %1290 = vtanh.f32 %v753_v19  ;;  %v541_v30 = vpop.permute.xlu0 %540 }
 0x135   : > { %v746_v23 = vpop.permute.xlu1 %745  ;;  %v1281_v24 = vpop.eup %1280 }
 0x136   : > { %v755_v26 = vmul.f32 %v746_v23, %v1572_v43  ;;  %v1283_v31 = vpop.eup %1282  ;;  %v765_v33 = vmul.f32 0.5, %v1281_v24 }
 0x137   : > { %v764_v37 = vmul.f32 0.5, %v1283_v31 }
 0x138   : > { %1292 = vtanh.f32 %v755_v26  ;;  %v773_v42 = vadd.f32 0.5, %v765_v33  ;;  %v556_v45 = vpop.permute.xlu0 %555 }
 0x139   : > { %v546_v35 = vpop.permute.xlu1 %545  ;;  %1294 = vtanh.f32 %v754_v27  ;;  %v772_v52 = vadd.f32 0.5, %v764_v37 }
 0x13a   : > { %v1285_v36 = vpop.eup %1284 }
 0x13b   : > { %v1287_v40 = vpop.eup %1286  ;;  %v767_v48 = vmul.f32 0.5, %v1285_v36 }
 0x13c   : > { %v1289_v44 = vpop.eup %1288  ;;  %v766_v43 = vmul.f32 0.5, %v1287_v40  ;;  %v566_v1 = vpop.permute.xlu0 %565 }
 0x13d   : > { %v551_v49 = vpop.permute.xlu1 %550  ;;  %v768_v56 = vmul.f32 0.5, %v1289_v44  ;;  %v775_v59 = vadd.f32 0.5, %v767_v48 }
 0x13e   : > { %v1291_v47 = vpop.eup %1290  ;;  %v774_v0 = vadd.f32 0.5, %v766_v43 }
 0x13f   : > { %v769_v55 = vmul.f32 0.5, %v1291_v47  ;;  %v776_v9 = vadd.f32 0.5, %v768_v56 }
 0x140   : > { %v576_v16 = vpop.permute.xlu0 %575 }
 0x141   : > { %v561_v5 = vpop.permute.xlu1 %560  ;;  %v777_v8 = vadd.f32 0.5, %v769_v55 }
 0x142   : > { %v1293_v63 = vpop.eup %1292 }
 0x143   : > { %v1295_v4 = vpop.eup %1294  ;;  %v771_v25 = vmul.f32 0.5, %v1293_v63 }
 0x144   : > { %v770_v34 = vmul.f32 0.5, %v1295_v4 }
 0x145   : > { %v779_v21 = vadd.f32 0.5, %v771_v25  ;;  %v571_v23 = vpop.permute.xlu1 %570 }
 0x1f3   : > { %v1138_v46 = vpop.f32.mrb[0].mxu1 }
 0x1f4   : > { %v667_v50 = vadd.f32 %v1138_v46, %v546_v35  ;;  %v661_v51 = vpop.f32.mrb[1].mxu1 }
 0x1f5   : > { %v662_v53 = vadd.f32 %v661_v51, %v541_v30  ;;  %v778_v30 = vadd.f32 0.5, %v770_v34 }
 0x1f6   : > { %v1612_v54 = vmul.f32 %v773_v42, %v667_v50 }
 0x1f7   : > { %v1614_v57 = vmul.f32 %v772_v52, %v662_v53  ;;  %v1141_v58 = vpop.f32.mrb[2].mxu1 }
 0x1f8   : > { %v797_v60 = vmin.f32 %v1612_v54, 0.0  ;;  %v677_v61 = vadd.f32 %v1141_v58, %v556_v45  ;;  %v671_v62 = vpop.f32.mrb[3].mxu1  ;;  %vm789_vm9 = vcmp.gt.f32.partialorder %v1612_v54, 0.0 }
 0x1f9   : > { %v796_v2 = vmin.f32 %v1614_v57, 0.0  ;;  %v672_v3 = vadd.f32 %v671_v62, %v551_v49  ;;  %vm788_vm10 = vcmp.gt.f32.partialorder %v1614_v57, 0.0 }
 0x1fa   : > { %v806_v6 = vmul.f32 1.442695, %v797_v60  ;;  %v783_v7 = vmul.f32 %v775_v59, %v677_v61 }
 0x1fb   : > { %v804_v10 = vmul.f32 1.442695, %v796_v2  ;;  %v782_v11 = vmul.f32 %v774_v0, %v672_v3  ;;  %v1144_v20 = vpop.f32.mrb[4].mxu1 }
 0x1fc   : > { %1296 = vpow2.f32 %v806_v6  ;;  %v799_v28 = vmin.f32 %v783_v7, 0.0  ;;  %v687_v29 = vadd.f32 %v1144_v20, %v566_v1  ;;  %v681_v32 = vpop.f32.mrb[5].mxu1  ;;  %vm791_vm11 = vcmp.gt.f32.partialorder %v783_v7, 0.0 }
 0x1fd   : > { %1298 = vpow2.f32 %v804_v10  ;;  %v798_v12 = vmin.f32 %v782_v11, 0.0  ;;  %v682_v13 = vadd.f32 %v681_v32, %v561_v5  ;;  %vm790_vm12 = vcmp.gt.f32.partialorder %v782_v11, 0.0 }
 0x1fe   : > { %v810_v14 = vmul.f32 1.442695, %v799_v28  ;;  %v785_v15 = vmul.f32 %v777_v8, %v687_v29  ;;  %v928_v10 = vmul.f32 %v1567_v41, %v1567_v41  ;;  %v930_v20 = vmul.f32 0.05, %v1567_v41 }
 0x1ff   : > { %v808_v17 = vmul.f32 1.442695, %v798_v12  ;;  %v784_v18 = vmul.f32 %v776_v9, %v682_v13  ;;  %v1147_v19 = vpop.f32.mrb[6].mxu1  ;;  %v846_v13 = vpop.permute.xlu0 %845 }
 0x200   : > { %1300 = vpow2.f32 %v810_v14  ;;  %v801_v24 = vmin.f32 %v785_v15, 0.0  ;;  %v697_v26 = vadd.f32 %v1147_v19, %v576_v16  ;;  %v691_v27 = vpop.f32.mrb[7].mxu1  ;;  %vm793_vm13 = vcmp.gt.f32.partialorder %v785_v15, 0.0  ;;  %v841_v14 = vpop.permute.xlu1 %840 }
 0x201   : > { %1302 = vpow2.f32 %v808_v17  ;;  %v800_v31 = vmin.f32 %v784_v18, 0.0  ;;  %v692_v33 = vadd.f32 %v691_v27, %v571_v23  ;;  %vm792_vm14 = vcmp.gt.f32.partialorder %v784_v18, 0.0 }
 0x202   : > { %v814_v35 = vmul.f32 1.442695, %v801_v24  ;;  %v787_v36 = vmul.f32 %v779_v21, %v697_v26 }
 0x203   : > { %v812_v37 = vmul.f32 1.442695, %v800_v31  ;;  %v786_v40 = vmul.f32 %v778_v30, %v692_v33 }
 0x204   : > { %1304 = vpow2.f32 %v814_v35  ;;  %v803_v42 = vmin.f32 %v787_v36, 0.0  ;;  %vm795_vm15 = vcmp.gt.f32.partialorder %v787_v36, 0.0 }
 0x205   : > { %1306 = vpow2.f32 %v812_v37  ;;  %v802_v44 = vmin.f32 %v786_v40, 0.0  ;;  %vm794_vm0 = vcmp.gt.f32.partialorder %v786_v40, 0.0 }
 0x206   : > { %v1297_v45 = vpop.eup %1296  ;;  %v818_v46 = vmul.f32 1.442695, %v803_v42 }
 0x207   : > { %v1299_v47 = vpop.eup %1298  ;;  %v816_v48 = vmul.f32 1.442695, %v802_v44  ;;  %v1066_v49 = vadd.f32 -1.0, %v1297_v45 }
 0x208   : > { %1308 = vpow2.f32 %v818_v46  ;;  %v1065_v50 = vadd.f32 -1.0, %v1299_v47 }
 0x209   : > { %1310 = vpow2.f32 %v816_v48  ;;  %v829_v51 = vsel %vm789_vm9, %v1612_v54, %v1066_v49 }
 0x20a   : > { %v1301_v52 = vpop.eup %1300  ;;  %v828_v43 = vsel %vm788_vm10, %v1614_v57, %v1065_v50 }
 0x20b   : > { %v1303_v53 = vpop.eup %1302  ;;  %v1183_v55 = vpack.c.bf16 %v829_v51, %v828_v43  ;;  %v1068_v56 = vadd.f32 -1.0, %v1301_v52 }
 0x20c   : > { %v1067_v58 = vadd.f32 -1.0, %v1303_v53 }
 0x20d   : > { %1184 = vmatprep.subr.bf16.mxu0 %v1183_v55  ;;  %v831_v59 = vsel %vm791_vm11, %v783_v7, %v1068_v56 }
 0x20e   : > { %v1305_v60 = vpop.eup %1304  ;;  %1186 = vmatpush3.bf16.msra.mxu0 %v1183_v55  ;;  %v830_v61 = vsel %vm790_vm12, %v782_v11, %v1067_v58  ;;  %v929_v11 = vmul.f32 -4.975, %v928_v10 }
 0x20f   : > { %v1307_v62 = vpop.eup %1306  ;;  %v1187_v63 = vpack.c.bf16 %v831_v59, %v830_v61  ;;  %v1070_v0 = vadd.f32 -1.0, %v1305_v60 }
 0x210   : > { %v1069_v1 = vadd.f32 -1.0, %v1307_v62  ;;  %v931_v25 = vsub.f32 %v929_v11, %v930_v20 }
 0x211   : > { %1188 = vmatprep.subr.bf16.mxu0 %v1187_v63  ;;  %v833_v54 = vsel %vm793_vm13, %v785_v15, %v1070_v0 }
 0x212   : > { %v1309_v57 = vpop.eup %1308  ;;  %1190 = vmatpush3.bf16.msra.mxu0 %v1187_v63  ;;  %v832_v2 = vsel %vm792_vm14, %v784_v18, %v1069_v1  ;;  %v932_v28 = vmul.f32 2.0, %v931_v25 }
 0x213   : > { %v1311_v3 = vpop.eup %1310  ;;  %v1191_v4 = vpack.c.bf16 %v833_v54, %v832_v2  ;;  %v1072_v5 = vadd.f32 -1.0, %v1309_v57 }
 0x214   : > { %v1071_v6 = vadd.f32 -1.0, %v1311_v3  ;;  %v933_v29 = vmul.f32 1.442695, %v932_v28 }
 0x215   : > { %1192 = vmatprep.subr.bf16.mxu0 %v1191_v4  ;;  %v835_v7 = vsel %vm795_vm15, %v787_v36, %v1072_v5 }
 0x216   : > { %1194 = vmatpush3.bf16.msra.mxu0 %v1191_v4  ;;  %v834_v8 = vsel %vm794_vm0, %v786_v40, %v1071_v6  ;;  %1312 = vpow2.f32 %v933_v29 }
 0x217   : > { %v1195_v9 = vpack.c.bf16 %v835_v7, %v834_v8 }
 0x219   : > { %1196 = vmatprep.subr.bf16.mxu0 %v1195_v9 }
 0x21a   : > { %1198 = vmatpush3.bf16.msra.mxu0 %v1195_v9 }
 0x21d   : > { %1165 = vmatmul.mubr.msk.f32.vlgmr.msra.gmra.mrb[6].mxu0 %vm848_vm8, %v1601_v22 }
 0x220   : > { %v1313_v32 = vpop.eup %1312 }
 0x221   : > { %v935_v34 = vsub.f32 1.0, %v1313_v32 }
 0x223   : > { %1314 = vrsqrt.f32 %v935_v34 }
 0x22d   : > { %v1315_v12 = vpop.eup %1314 }
 0x22e   : > { %v941_v22 = vrot.slane %v1315_v12, %v461_v39 }
 0x2f0   : > { %v1166_v15 = vpop.f32.mrb[6].mxu0 }
 0x2f1   : > { %v925_v41 = vadd.f32 %v1166_v15, %v846_v13  ;;  %v919_v16 = vpop.f32.mrb[7].mxu0 }
 0x2f2   : > { %v920_v17 = vadd.f32 %v919_v16, %v841_v14 }
 0x2f3   : > { %v944_v18 = vmul.f32 %v941_v22, %v925_v41 }
 0x2f4   : > { %v943_v38 = vmul.f32 %v941_v22, %v920_v17 }
 0x2f5   : > { %946 = vst [vmem:[%s271_s7 + $0x8] sm:$0xff] %v944_v18 }
 0x2f6   : > { %945 = vst [vmem:[%s271_s7] sm:$0xff] %v943_v38 }
 0x2f7   : > { %1329 = shalt.err (!%p1326_p7)
}
 0x2f8   : > { %s1330_s12 = scalar_lea.hbm %s1636_s15, 256  ;;  %s1334_s26 = scalar_lea.hbm %s1687_s5, 512 }
 0x2f9   : > { %p1331_p10 = scmp.ne.s32.totalorder %s1636_s15, %s1330_s12  ;;  %p1335_p13 = scmp.lt.u32.totalorder %s1636_s15, %s1687_s5 }
 0x2fa   : > { %p1336_p0 = scmp.lt.u32.totalorder %s1334_s26, %s1330_s12  ;;  %p1338_p2 = scmp.lt.u32.totalorder %s1330_s12, %s1636_s15 }
 0x2fb   : > { %p1332_p11 = pnand %p1331_p10, %p1458_p6 }
 0x2fc   : > { %p1337_p1 = por %p1336_p0, %p1335_p13 }
 0x2fd   : > { %p1333_p12 = pneg %p1332_p11 }
 0x2fe   : > { %p1339_p3 = por %p1338_p2, %p1337_p1 }
 0x300   : > { %p1340_p4 = pnand %p1339_p3, %p1333_p12 }
 0x302   : > { %1343 = shalt.err (!%p1340_p4)
}
 0x303   : > { %s1386_s7 = smov 128   ;;  %s1387_s9 = smov 256  }
 0x304   : > { %s1388_s10 = smov 8  }
 0x305   : > { %1199 = dma.vmem_to_hbm [thread:$0]  (%p1458_p6), %s1631_s8, 256, %s1636_s15, %s1640_s13, %s1386_s7, %s1387_s9, %s1388_s10  }
 0x306 PF: > { %s975_s11 = sand.u32 1, %s1366_s18   ;;  %p1202_p5 = pnand %p1039_p9, %p1462_p8 }
 0x307   : > { %s976_s22 = scalar_lea.sflag [#allocation4], %s975_s11 }
 0x308   : > { %1361 = dma.done.wait (!%p1202_p5), %s976_s22, 256  }
 0x309   : > { %1363 = vsyncadd (!%p1202_p5), %s976_s22, 4294967040  ;;  %p15_p7 = scmp.ge.s32.totalorder %s1444_s24, 4   ;;  %s1690_s18 = smov %s1370_s19 }
 0x30a   : > { %s1691_s19 = smov %s1374_s20  ;;  %s1692_s20 = smov %s1456_s27 }
 0x30b   : > { %s1693_s21 = smov %s1444_s24  ;;  %17 = sbr.rel (!%p15_p7) target bundleno = 3 (0x3), region = 121 }
 0x312   :  { %981 = vsyncpa [#allocation4], 1 }
 0x313   :  { %983 = vsyncpa [#allocation4 + $0x1], 1 }

</bundles_post_ra>
